<compile_context>
chip_gen: v6e
topology: v6e:2x2x1
jax: 0.10.0
libtpu: 0.0.40
codegen_flags: <defaults>
</compile_context>

<pallas_src>
import functools
import math

import numpy as np
import jax
import jax.numpy as jnp
from jax import lax
from jax.experimental import pallas as pl
from jax.experimental.pallas import tpu as pltpu

KERNEL_NONE = 0
KERNEL_RAMP = 1
KERNEL_HAMMING = 2
KERNEL_GAUSSIAN_RAMP = 4


class MandoFanBeamConfig:
    def __init__(self, **kw):
        self.__dict__.update(kw)


# ----------------------------------------------------------------------------
# Small helpers
# ----------------------------------------------------------------------------
def _round_up(n, m):
    return ((n + m - 1) // m) * m


def _vmem_cap():
    """Usable VMEM target per generation (~75% of physical: ~48MiB on v7x,
    ~96MiB on v5e/v6e).  Falls back to 48MiB if the query is unavailable."""
    try:
        phys = int(pltpu.get_tpu_info().vmem_capacity_bytes)
    except Exception:
        phys = 64 << 20
    return (phys * 3) // 4


# ----------------------------------------------------------------------------
# Filter initialisation (deterministic, mirrors zxInitGaussianFilter / Ramp)
# ----------------------------------------------------------------------------
def zx_init_gaussian_filter(N, sigma, du):
    center = N // 2 - 1
    i = np.arange(N, dtype=np.float64)
    g = np.exp(-(i - center) ** 2 / (2.0 * float(sigma) ** 2))
    return (g / g.sum() / float(du)).astype(np.float32)


def zx_init_ramp_filter(N, du):
    center = N // 2 - 1
    f = np.zeros(N, dtype=np.float64)
    for i in range(N):
        if (i - center) % 2 != 0:
            f[i] = -1.0 / (math.pi * (i - center) * float(du)) ** 2
    f[center] = 1.0 / (2.0 * float(du)) ** 2
    return f.astype(np.float32)


def conv_same_matrix(ker, width):
    """Toeplitz M so that (row @ M)[j] == F.conv1d(row, ker, padding='same')[j]."""
    N = ker.shape[0]
    left = (N - 1) // 2
    w = np.arange(width)[:, None]
    j = np.arange(width)[None, :]
    t = w - j + left
    valid = (t >= 0) & (t < N)
    M = np.where(valid, ker[np.clip(t, 0, N - 1)], 0.0).astype(np.float32)
    return M


# ----------------------------------------------------------------------------
# Pallas kernel 1: fused sinogram filtering (single Toeplitz matmul, row-tiled)
# ----------------------------------------------------------------------------
def _filter_kernel(x_ref, m_ref, o_ref):
    # du scaling, cosine pre-weighting and sid^2*dbeta are folded into m_ref.
    o_ref[...] = jnp.dot(x_ref[...], m_ref[...], preferred_element_type=jnp.float32)


def filter_sinogram(x, fused_mat, Wp, tile_rows=256):
    B, V, W = x.shape
    R = B * V
    x2 = x.reshape(R, W).astype(jnp.float32)
    if Wp != W:                                   # lane-dense detector axis
        x2 = jnp.pad(x2, ((0, 0), (0, Wp - W)))
    if R <= tile_rows:
        tr = _round_up(max(R, 8), 8)
    else:
        tr = tile_rows
    R_pad = _round_up(R, tr)                      # keep sublane tiling intact
    if R_pad != R:
        x2 = jnp.pad(x2, ((0, R_pad - R), (0, 0)))

    cap = _vmem_cap()
    need = 4 * (2 * 2 * tr * Wp + 2 * Wp * Wp) + (2 << 20)
    vmem = int(min(max(need, 8 << 20), cap))

    out = pl.pallas_call(
        _filter_kernel,
        out_shape=jax.ShapeDtypeStruct((R_pad, Wp), jnp.float32),
        grid=(R_pad // tr,),
        in_specs=[
            pl.BlockSpec((tr, Wp), lambda i: (i, 0)),     # streamed row tiles
            pl.BlockSpec((Wp, Wp), lambda i: (0, 0)),     # conv matrix stays resident
        ],
        out_specs=pl.BlockSpec((tr, Wp), lambda i: (i, 0)),
        compiler_params=pltpu.CompilerParams(
            dimension_semantics=("parallel",),
            vmem_limit_bytes=vmem,
        ),
    )(x2, fused_mat)
    return out[:R].reshape(B, V, Wp)


# ----------------------------------------------------------------------------
# Gather feature probe: does jnp.take_along_axis lower on this Mosaic version
# at our padded detector width?  Run once (eagerly) at layer construction.
# ----------------------------------------------------------------------------
def _probe_take_along_axis(Wp, D):
    rows = 8

    def k(x_ref, i_ref, o_ref):
        src = jnp.broadcast_to(x_ref[0][None, :], (rows, Wp))
        o_ref[...] = jnp.take_along_axis(src, i_ref[...], axis=1)

    x = (jnp.arange(Wp, dtype=jnp.float32) * 0.5 + 1.0).reshape(1, Wp)
    idx = ((jnp.arange(rows * D, dtype=jnp.int32).reshape(rows, D) * 13 + 3) % Wp)
    try:
        out = pl.pallas_call(
            k, out_shape=jax.ShapeDtypeStruct((rows, D), jnp.float32),
        )(x, idx)
        out = jax.block_until_ready(out)
        ref = jnp.take_along_axis(jnp.broadcast_to(x, (rows, Wp)), idx, axis=1)
        return bool(jnp.allclose(out, ref))
    except Exception:
        return False


# ----------------------------------------------------------------------------
# Pallas kernel 2: fan-beam FBP backprojection (KERNEL_NONE path)
# ----------------------------------------------------------------------------
def _bp_kernel(geom, use_gather, tbl_ref, sgm_ref, out_ref):
    (V, W, Wp, D, TD, sid, u_off, px, x_c, y_c) = geom

    dt = pl.program_id(1)

    # Pixel grid for this image-row tile: computed once per grid step and
    # reused for all V views (hoisted broadcasts; image y axis points up).
    row_f = (lax.broadcasted_iota(jnp.int32, (TD, D), 0).astype(jnp.float32)
             + (dt * TD).astype(jnp.float32))
    col_f = lax.broadcasted_iota(jnp.int32, (TD, D), 1).astype(jnp.float32)
    x = (col_f - (D - 1) / 2.0) * px + x_c
    y = ((D - 1) / 2.0 - row_f) * px + y_c

    out_ref[...] = jnp.zeros_like(out_ref)        # accumulate in resident block

    if not use_gather:
        w_iota = lax.broadcasted_iota(jnp.int32, (1, 1, Wp), 2).astype(jnp.float32)

    def body(v, carry):
        # Per-view scalars from the SMEM table: [cos, sin, cos*sdd/du, sin*sdd/du]
        cb = tbl_ref[0, v]
        sb = tbl_ref[1, v]
        cbk = tbl_ref[2, v]
        sbk = tbl_ref[3, v]

        L = sid - (x * cb + y * sb)               # distance along the central ray
        rL = 1.0 / L                              # exact reciprocal (reused twice)
        u = (y * cbk - x * sbk) * rL + u_off      # detector coordinate (float idx)

        row = sgm_ref[v]                          # (Wp,) filtered+weighted view row

        if use_gather:
            # True 2-tap gather: O(1) work per pixel per view.
            i0f = jnp.floor(u)
            fr = u - i0f
            i0 = i0f.astype(jnp.int32)
            i1 = i0 + 1
            rowb = jnp.broadcast_to(row[None, :], (TD, Wp))
            g0 = jnp.take_along_axis(rowb, jnp.clip(i0, 0, Wp - 1), axis=1)
            g1 = jnp.take_along_axis(rowb, jnp.clip(i1, 0, Wp - 1), axis=1)
            val = (jnp.where((i0 >= 0) & (i0 < W), (1.0 - fr) * g0, 0.0)
                   + jnp.where((i1 >= 0) & (i1 < W), fr * g1, 0.0))
        else:
            # Fallback (gather lowering unavailable): hat-function "one-hot"
            # interpolation reduced over the padded detector axis.  Same
            # boundary semantics (out-of-range taps contribute 0).
            # TODO(synk): could be pushed onto the MXU via dot_general if the
            #             gather path is ever unavailable at production sizes.
            hat = jnp.maximum(1.0 - jnp.abs(u[..., None] - w_iota), 0.0)
            val = jnp.sum(hat * row, axis=-1)

        # sid^2 * dbeta is folded into the fused filter matrix, so the
        # per-view weight is exactly 1/L^2.
        out_ref[...] += (rL * rL) * val
        return carry

    lax.fori_loop(0, V, body, 0, unroll=(min(4, V) if use_gather else 1))


def _pick_td_gather(D, B):
    if D % 8 != 0:
        return D
    td = D

    def ok(t):
        return t <= 128 and (B > 1 or t < D or D <= 8)

    while not ok(td):
        nxt = td // 2
        if nxt % 8 != 0 or D % nxt != 0:
            break
        td = nxt
    return td


def _pick_td_onehot(D, Wp, B, budget=4 << 20):
    if D % 8 != 0:
        return D
    td = D

    def ok(t):
        return t * D * Wp * 4 <= budget and (B > 1 or t < D or D <= 8)

    while td > 8 and not ok(td):
        nxt = td // 2
        if nxt % 8 != 0 or D % nxt != 0:
            break
        td = nxt
    return td


def fanbeam_fbp_backproject(sgm_p, cfg, W_real, use_gather):
    B, V, Wp = sgm_p.shape
    D = int(cfg.imgDim)
    sid = float(cfg.sid)
    sdd = float(cfg.sdd)
    du = float(cfg.detEltSize)

    betas = np.deg2rad(float(cfg.imgRot) + float(cfg.startAngle)
                       + np.arange(V) * float(cfg.totalScanAngle) / V)
    kd = sdd / du
    tbl = np.stack([np.cos(betas), np.sin(betas),
                    np.cos(betas) * kd, np.sin(betas) * kd]).astype(np.float32)  # (4,V)
    u_off = (W_real - 1) / 2.0 - float(cfg.detOffCenter) / du

    TD = _pick_td_gather(D, B) if use_gather else _pick_td_onehot(D, Wp, B)

    geom = (V, W_real, Wp, D, TD, sid, u_off, float(cfg.pixelSize),
            float(cfg.imgXCenter), float(cfg.imgYCenter))

    cap = _vmem_cap()
    resident = 2 * V * Wp * 4 + 2 * TD * D * 4
    if use_gather:
        transient = 16 * TD * D * 4 + 4 * TD * Wp * 4
    else:
        transient = 3 * TD * D * Wp * 4
    vmem = int(min(max(resident + transient + (2 << 20), 8 << 20), cap))

    return pl.pallas_call(
        functools.partial(_bp_kernel, geom, use_gather),
        out_shape=jax.ShapeDtypeStruct((B, D, D), jnp.float32),
        grid=(B, D // TD),
        in_specs=[
            pl.BlockSpec(memory_space=pltpu.MemorySpace.SMEM),        # (4, V) trig table
            pl.BlockSpec((None, V, Wp), lambda b, d: (b, 0, 0)),      # full per-batch sinogram
        ],
        out_specs=pl.BlockSpec((None, TD, D), lambda b, d: (b, d, 0)),
        compiler_params=pltpu.CompilerParams(
            dimension_semantics=("parallel", "parallel"),
            vmem_limit_bytes=vmem,
        ),
    )(jnp.asarray(tbl), sgm_p)


# ----------------------------------------------------------------------------
# Layer
# ----------------------------------------------------------------------------
class MandoFanbeamFbpLayerNext:
    def __init__(self, cfg: MandoFanBeamConfig):
        self.cfg = cfg
        W = int(cfg.detEltCount)
        du = float(cfg.detEltSize)
        self.W = W
        self.Wp = _round_up(W, 128)                 # lane-dense detector axis

        filters = []
        if cfg.reconKernelEnum == KERNEL_GAUSSIAN_RAMP:
            filters.append(zx_init_gaussian_filter(W, cfg.reconKernelParam, du))
            filters.append(zx_init_ramp_filter(W, du))
        elif cfg.reconKernelEnum == KERNEL_RAMP:
            filters.append(zx_init_ramp_filter(W, du))
        elif cfg.reconKernelEnum == KERNEL_HAMMING:
            raise NotImplementedError(
                "Hamming filter is not implemented yet. Use KERNEL_RAMP instead.")

        # Fuse all sequential filter passes (each a Toeplitz matmul * du) into
        # one matrix, then fold the fan-beam cosine pre-weighting AND the
        # constant backprojection scale sid^2*dbeta into its columns (all
        # linear, exact up to fp rounding).
        M = np.eye(W, dtype=np.float64)
        for f in filters:
            M = M @ (conv_same_matrix(f, W).astype(np.float64) * du)
        u = (np.arange(W, dtype=np.float64) - (W - 1) / 2.0) * du + float(cfg.detOffCenter)
        cosw = float(cfg.sdd) / np.sqrt(float(cfg.sdd) ** 2 + u ** 2)
        dbeta = math.radians(float(cfg.totalScanAngle)) / float(cfg.views)
        wscale = float(cfg.sid) ** 2 * dbeta
        fused = (M * cosw[None, :] * wscale).astype(np.float32)
        fused_p = np.zeros((self.Wp, self.Wp), dtype=np.float32)
        fused_p[:W, :W] = fused
        self.fused_mat = jnp.asarray(fused_p)

        # Feature-detect the 2-tap lane gather once (eagerly, outside any jit)
        # at the real padded detector width; fall back to hat one-hot if not
        # supported by this Mosaic version.
        self._use_gather = _probe_take_along_axis(self.Wp, int(cfg.imgDim))

    def __call__(self, x):
        # Single fused pass: all zxFilterSinogram kernels + cosine pre-weight
        # + sid^2*dbeta, output kept detector-padded (lane-dense) for the BP.
        x = filter_sinogram(x, self.fused_mat, self.Wp)
        # NoneKernel context -> backprojection only.
        return fanbeam_fbp_backproject(x, self.cfg, self.W, self._use_gather)


# ----------------------------------------------------------------------------
if __name__ == "__main__":
    cfg = MandoFanBeamConfig(
        sgmHeight=8, sgmWidth=16, views=8,
        detEltCount=16, detEltSize=2.0, detOffCenter=0.0,
        sid=40.0, sdd=80.0,
        imgDim=16, pixelSize=1.0,
        imgRot=0.0, imgXCenter=0.0, imgYCenter=0.0,
        startAngle=0.0, totalScanAngle=360.0,
        reconKernelEnum=KERNEL_GAUSSIAN_RAMP, reconKernelParam=1.5,
    )

    layer = MandoFanbeamFbpLayerNext(cfg)

    key = jax.random.PRNGKey(0)
    # sinogram: (batch, views, det_count)
    x = jax.random.uniform(key, (2, cfg.views, cfg.detEltCount), dtype=jnp.float32)

    img = layer(x)
    img = jax.block_until_ready(img)
    assert img.shape == (2, cfg.imgDim, cfg.imgDim), img.shape
    assert img.dtype == jnp.float32
    assert bool(jnp.all(jnp.isfinite(img)))
    print("KERNEL_OK")
</pallas_src>

<mosaic_0001>
module attributes {stable_mosaic.version = 11 : i64} {
  func.func @k(%arg0: memref<1x128xf32, #tpu.memory_space<vmem>>, %arg1: memref<8x16xi32, #tpu.memory_space<vmem>>, %arg2: memref<8x16xf32, #tpu.memory_space<vmem>>) attributes {dimension_semantics = [], scalar_prefetch = 0 : i64, scratch_operands = 0 : i64, tpu.core_type = #tpu.core_type<tc>} {
    %c0 = arith.constant 0 : index
    %c0_0 = arith.constant 0 : index
    %0 = vector.load %arg0[%c0, %c0_0] : memref<1x128xf32, #tpu.memory_space<vmem>>, vector<1x128xf32>
    %1 = vector.shape_cast %0 : vector<1x128xf32> to vector<128xf32>
    %2 = vector.shape_cast %1 : vector<128xf32> to vector<1x128xf32>
    %3 = vector.shape_cast %2 : vector<1x128xf32> to vector<1x128xf32>
    %4 = vector.broadcast %3 : vector<1x128xf32> to vector<8x128xf32>
    %c0_1 = arith.constant 0 : index
    %c0_2 = arith.constant 0 : index
    %5 = vector.load %arg1[%c0_1, %c0_2] : memref<8x16xi32, #tpu.memory_space<vmem>>, vector<8x16xi32>
    %c0_i32 = arith.constant 0 : i32
    %6 = vector.broadcast %c0_i32 : i32 to vector<8x16xi32>
    %7 = arith.cmpi slt, %5, %6 : vector<8x16xi32>
    %c128_i32 = arith.constant 128 : i32
    %8 = vector.broadcast %c128_i32 : i32 to vector<8x16xi32>
    %9 = arith.addi %5, %8 : vector<8x16xi32>
    %10 = arith.select %7, %9, %5 : vector<8x16xi1>, vector<8x16xi32>
    %11 = vector.shape_cast %10 : vector<8x16xi32> to vector<8x16x1xi32>
    %12 = vector.shape_cast %11 : vector<8x16x1xi32> to vector<8x16xi32>
    %13 = tpu.dynamic_gather %4[%12] in [1] : vector<8x128xf32>, vector<8x16xi32> -> vector<8x16xf32>
    %c0_3 = arith.constant 0 : index
    %c0_4 = arith.constant 0 : index
    %14 = vector.load %arg2[%c0_3, %c0_4] : memref<8x16xf32, #tpu.memory_space<vmem>>, vector<8x16xf32>
    tpu.vector_store %arg2[%c0_3, %c0_4], %13 {strides = array<i32>} : memref<8x16xf32, #tpu.memory_space<vmem>>, vector<8x16xf32>,
    return
  }
}

module attributes {stable_mosaic.version = 11 : i64} {
  func.func @_filter_kernel(%arg0: i32, %arg1: memref<16x128xf32, #tpu.memory_space<vmem>>, %arg2: memref<128x128xf32, #tpu.memory_space<vmem>>, %arg3: memref<16x128xf32, #tpu.memory_space<vmem>>) attributes {dimension_semantics = [#tpu.dimension_semantics<parallel>], iteration_bounds = array<i64: 1>, scalar_prefetch = 0 : i64, scratch_operands = 0 : i64, tpu.core_type = #tpu.core_type<tc>, window_params = [{transform_indices = @transform_0, window_bounds = array<i64: 16, 128>}, {pipeline_mode = #tpu.pipeline_mode<synchronous>, transform_indices = @transform_1, window_bounds = array<i64: 128, 128>}, {transform_indices = @transform_2, window_bounds = array<i64: 16, 128>}]} {
    %c0 = arith.constant 0 : index
    %c0_0 = arith.constant 0 : index
    %0 = vector.load %arg1[%c0, %c0_0] : memref<16x128xf32, #tpu.memory_space<vmem>>, vector<16x128xf32>
    %c0_1 = arith.constant 0 : index
    %c0_2 = arith.constant 0 : index
    %1 = vector.load %arg2[%c0_1, %c0_2] : memref<128x128xf32, #tpu.memory_space<vmem>>, vector<128x128xf32>
    %cst = arith.constant dense<0.000000e+00> : vector<16x128xf32>
    %2 = tpu.matmul %0, %1, %cst {dimension_numbers = #tpu.dot_dimension_numbers<[1], [0], [0], [1], [0, 0, 1, 1], [], []>} : vector<16x128xf32>, vector<128x128xf32>, vector<16x128xf32> -> vector<16x128xf32>
    %c0_3 = arith.constant 0 : index
    %c0_4 = arith.constant 0 : index
    %3 = vector.load %arg3[%c0_3, %c0_4] : memref<16x128xf32, #tpu.memory_space<vmem>>, vector<16x128xf32>
    tpu.vector_store %arg3[%c0_3, %c0_4], %2 {strides = array<i32>} : memref<16x128xf32, #tpu.memory_space<vmem>>, vector<16x128xf32>,
    return
  }
  func.func @transform_0(%arg0: i32) -> (i32, i32) {
    %c0_i32 = arith.constant 0 : i32
    %c0_i32_0 = arith.constant 0 : i32
    return %arg0, %c0_i32 : i32, i32
  }
  func.func @transform_1(%arg0: i32) -> (i32, i32) {
    %c0_i32 = arith.constant 0 : i32
    %c0_i32_0 = arith.constant 0 : i32
    %c0_i32_1 = arith.constant 0 : i32
    return %c0_i32, %c0_i32_0 : i32, i32
  }
  func.func @transform_2(%arg0: i32) -> (i32, i32) {
    %c0_i32 = arith.constant 0 : i32
    %c0_i32_0 = arith.constant 0 : i32
    return %arg0, %c0_i32 : i32, i32
  }
}

</mosaic_0001>

<bundles_post_ra>
// kernel: tpu_custom_call.1
= control target key start
LH: loop header
LB: loop body
LE: loop exit
PB: predicated region body
PF: predicated region fallthrough
CT: control target
= control target key end

     0   :  { %7 = vsyncpa [#allocation3], 0  ;;  %s166_s0 = inlined_call_operand.hbm [shape: f32[1,128], index: 0, kind: input, shape index: {}]   ;;  %s167_s1 = inlined_call_operand.hbm [shape: s32[8,16], index: 1, kind: input, shape index: {}]   ;;  %s168_s2 = inlined_call_operand.hbm [shape: f32[8,16], index: 2, kind: output, shape index: {}]  }
   0x1   :  { %8 = vsyncpa [#allocation6], 0 }
   0x2   :  { %9 = vsyncpa [#allocation4], 0  ;;  %s139_s9 = smov [#allocation2]   ;;  %s140_s11 = smov [#allocation5]  }
   0x3   :  { %s16_s10 = sshll.u32 %s139_s9, 4  ;;  %s26_s12 = sshll.u32 %s140_s11, 4  ;;  %s17_s10 = int_to_ptr.vmem [resolvable:$true] %s16_s10  ;;  %s27_s12 = int_to_ptr.vmem [resolvable:$true] %s26_s12 }
   0x4   :  { %s81_s13 = scalar_lea.vmem %s17_s10, 16  ;;  %s85_s14 = scalar_lea.vmem %s17_s10, 32 }
   0x5   :  { %p82_p0 = scmp.ne.s32.totalorder %s17_s10, %s81_s13  ;;  %p86_p1 = scmp.lt.s32.totalorder %s17_s10, %s17_s10 }
   0x6   :  { %p87_p2 = scmp.lt.s32.totalorder %s85_s14, %s81_s13 }
   0x8   :  { %p88_p3 = por %p87_p2, %p86_p1 }
   0xa   :  { %p89_p4 = pnand %p88_p3, %p82_p0 }
   0xc   :  { %92 = shalt.err (!%p89_p4)
}
   0xd   :  { %19 = dma.hbm_to_vmem [thread:$0]  %s166_s0, 16, %s17_s10, [#allocation3]  }
   0xe   :  { %s101_s17 = scalar_lea.vmem %s27_s12, 128  ;;  %p106_p6 = scmp.lt.s32.totalorder %s27_s12, %s27_s12 }
   0xf   :  { %p102_p5 = scmp.ne.s32.totalorder %s27_s12, %s101_s17  ;;  %p107_p7 = scmp.lt.s32.totalorder %s101_s17, %s101_s17 }
  0x11   :  { %p108_p8 = por %p107_p7, %p106_p6 }
  0x13   :  { %p109_p9 = pnand %p108_p8, %p102_p5 }
  0x15   :  { %112 = shalt.err (!%p109_p9)
}
  0x16   :  { %29 = dma.hbm_to_vmem [thread:$0]  %s167_s1, 128, %s27_s12, [#allocation6]  }
  0x17   :  { %133 = dma.done.wait [#allocation3], 16  }
  0x18   :  { %134 = vsyncadd [#allocation3], 4294967280 }
  0x19   :  { %135 = dma.done.wait [#allocation6], 128  }
  0x1a   :  { %136 = vsyncadd [#allocation6], 4294967168  ;;  %v43_v0 = vld [vmem:[#allocation5] sm:$0xff]  ;;  %v68_v3 = vld [vmem:[#allocation2] ss:$0 sm:$0xff]  ;;  %s141_s0 = smov [#allocation7]  }
  0x1b   :  { %vm44_vm0 = vcmp.lt.s32.totalorder %v43_v0, 0  ;;  %v45_v1 = vadd.s32 128, %v43_v0  ;;  %s58_s20 = sshll.u32 %s141_s0, 4  ;;  %vm50_vm1 = vcmask 130048   ;;  %s59_s20 = int_to_ptr.vmem [resolvable:$true] %s58_s20 }
  0x1c   :  { %s113_s21 = scalar_lea.vmem %s59_s20, 128  ;;  %p118_p11 = scmp.lt.s32.totalorder %s59_s20, %s59_s20 }
  0x1d   :  { %v46_v2 = vsel %vm44_vm0, %v45_v1, %v43_v0  ;;  %p114_p10 = scmp.ne.s32.totalorder %s59_s20, %s113_s21  ;;  %p119_p12 = scmp.lt.s32.totalorder %s113_s21, %s113_s21 }
  0x1e   :  { %72 = vset.pattern.permute.xlu0 %v46_v2 }
  0x1f   :  { %p120_p13 = por %p119_p12, %p118_p11 }
  0x21   :  { %p121_p0 = pnand %p120_p13, %p114_p10 }
  0x22   :  { %48 = vperm.xlu0 %72, %v68_v3  }
  0x9d   :  { %v49_v4 = vpop.permute.xlu0 %48 }
  0x9e   :  { %51 = vst.msk [vmem:[#allocation7] sm:$0xff] %vm50_vm1, %v49_v4 }
  0x9f   :  { %124 = shalt.err (!%p121_p0)
}
  0xa0   :  { %61 = dma.vmem_to_hbm [thread:$0]  %s59_s20, 128, %s168_s2, [#allocation4]  }
  0xa1   :  { %137 = dma.done.wait [#allocation4], 128  }
  0xa2   :  { %138 = vsyncadd [#allocation4], 4294967168 }
  0xa3   :  { %65 = vsyncpa [#allocation3], 1 }
  0xa4   :  { %66 = vsyncpa [#allocation6], 1 }
  0xa5   :  { %67 = vsyncpa [#allocation4], 1 }

// kernel: tpu_custom_call.1
= control target key start
LH: loop header
LB: loop body
LE: loop exit
PB: predicated region body
PF: predicated region fallthrough
CT: control target
= control target key end

     0   :  { %7 = vsyncpa [#allocation3], 0  ;;  %s315_s0 = inlined_call_operand.hbm [shape: f32[16,128], index: 0, kind: input, shape index: {}]   ;;  %s316_s1 = inlined_call_operand.hbm [shape: f32[128,128], index: 1, kind: input, shape index: {}]   ;;  %s317_s2 = inlined_call_operand.hbm [shape: f32[16,128], index: 2, kind: output, shape index: {}]  }
   0x1   :  { %8 = vsyncpa [#allocation6], 0 }
   0x2   :  { %9 = vsyncpa [#allocation4], 0  ;;  %s277_s9 = smov [#allocation2]  }
   0x3   :  { %s15_s10 = sshll.u32 %s277_s9, 4  ;;  %s16_s10 = int_to_ptr.vmem [resolvable:$true] %s15_s10 }
   0x4   :  { %s219_s11 = scalar_lea.vmem %s16_s10, 256  ;;  %p224_p1 = scmp.lt.s32.totalorder %s16_s10, %s16_s10 }
   0x5   :  { %p220_p0 = scmp.ne.s32.totalorder %s16_s10, %s219_s11  ;;  %p225_p2 = scmp.lt.s32.totalorder %s219_s11, %s219_s11 }
   0x7   :  { %p226_p3 = por %p225_p2, %p224_p1 }
   0x9   :  { %p227_p4 = pnand %p226_p3, %p220_p0 }
   0xb   :  { %230 = shalt.err (!%p227_p4)
}
   0xc   :  { %s278_s12 = smov 128   ;;  %s279_s13 = smov 8  }
   0xd   :  { %21 = dma.hbm_to_vmem [thread:$0]  %s315_s0, 256, %s16_s10, [#allocation3], %s278_s12, %s278_s12, %s279_s13  }
   0xe   :  { %s280_s16 = smov [#allocation5]  }
   0xf   :  { %s27_s17 = sshll.u32 %s280_s16, 4  ;;  %s28_s17 = int_to_ptr.vmem [resolvable:$true] %s27_s17 }
  0x10   :  { %s239_s18 = scalar_lea.vmem %s28_s17, 2048  ;;  %p244_p6 = scmp.lt.s32.totalorder %s28_s17, %s28_s17 }
  0x11   :  { %p240_p5 = scmp.ne.s32.totalorder %s28_s17, %s239_s18  ;;  %p245_p7 = scmp.lt.s32.totalorder %s239_s18, %s239_s18 }
  0x13   :  { %p246_p8 = por %p245_p7, %p244_p6 }
  0x15   :  { %p247_p9 = pnand %p246_p8, %p240_p5 }
  0x17   :  { %250 = shalt.err (!%p247_p9)
}
  0x18   :  { %33 = dma.hbm_to_vmem [thread:$0]  %s316_s1, 2048, %s28_s17, [#allocation6], %s278_s12, %s278_s12, %s279_s13  }
  0x19   :  { %271 = dma.done.wait [#allocation3], 256  }
  0x1a   :  { %272 = vsyncadd [#allocation3], 4294967040 }
  0x1b   :  { %273 = dma.done.wait [#allocation6], 2048  }
  0x1c   :  { %274 = vsyncadd [#allocation6], 4294965248  ;;  %v57_v0 = vld [vmem:[#allocation5 + $0x78] sm:$0xff]  ;;  %v56_v1 = vld [vmem:[#allocation5 + $0x70] sm:$0xff]  ;;  %s281_s0 = smov [#allocation7]  }
  0x1d   :  { %171 = vmatprep.subr.mxu0 %v57_v0  ;;  %v55_v2 = vld [vmem:[#allocation5 + $0x68] sm:$0xff]  ;;  %v54_v3 = vld [vmem:[#allocation5 + $0x60] sm:$0xff]  ;;  %v40_v4 = vld [vmem:[#allocation2] sm:$0xff]  ;;  %s140_s1 = sshll.u32 %s281_s0, 4  ;;  %s141_s1 = int_to_ptr.vmem [resolvable:$true] %s140_s1 }
  0x1e   :  { %172 = vmatpush3.msra.mxu0 %v57_v0  ;;  %v53_v5 = vld [vmem:[#allocation5 + $0x58] sm:$0xff]  ;;  %203 = vmatprep.mubr.f32.mxu0 %v40_v4  ;;  %v52_v6 = vld [vmem:[#allocation5 + $0x50] sm:$0xff]  ;;  %v51_v7 = vld [vmem:[#allocation5 + $0x48] sm:$0xff]  ;;  %s251_s21 = scalar_lea.vmem %s141_s1, 256  ;;  %p256_p11 = scmp.lt.s32.totalorder %s141_s1, %s141_s1 }
  0x1f   :  { %173 = vmatprep.subr.mxu0 %v56_v1  ;;  %v50_v8 = vld [vmem:[#allocation5 + $0x40] sm:$0xff]  ;;  %v49_v9 = vld [vmem:[#allocation5 + $0x38] sm:$0xff]  ;;  %v48_v10 = vld [vmem:[#allocation5 + $0x30] sm:$0xff]  ;;  %p252_p10 = scmp.ne.s32.totalorder %s141_s1, %s251_s21  ;;  %p257_p12 = scmp.lt.s32.totalorder %s251_s21, %s251_s21 }
  0x20   :  { %174 = vmatpush3.msra.mxu0 %v56_v1  ;;  %v47_v11 = vld [vmem:[#allocation5 + $0x28] sm:$0xff]  ;;  %v46_v12 = vld [vmem:[#allocation5 + $0x20] sm:$0xff]  ;;  %v45_v13 = vld [vmem:[#allocation5 + $0x18] sm:$0xff] }
  0x21   :  { %175 = vmatprep.subr.mxu0 %v55_v2  ;;  %v44_v14 = vld [vmem:[#allocation5 + $0x10] sm:$0xff]  ;;  %v43_v15 = vld [vmem:[#allocation5 + $0x8] sm:$0xff]  ;;  %v42_v16 = vld [vmem:[#allocation5] sm:$0xff]  ;;  %p258_p13 = por %p257_p12, %p256_p11 }
  0x22   :  { %176 = vmatpush3.msra.mxu0 %v55_v2  ;;  %v41_v17 = vld [vmem:[#allocation2 + $0x8] sm:$0xff] }
  0x23   :  { %177 = vmatprep.subr.mxu0 %v54_v3  ;;  %p259_p0 = pnand %p258_p13, %p252_p10 }
  0x24   :  { %178 = vmatpush3.msra.mxu0 %v54_v3 }
  0x25   :  { %179 = vmatprep.subr.mxu0 %v53_v5 }
  0x26   :  { %180 = vmatpush3.msra.mxu0 %v53_v5 }
  0x27   :  { %181 = vmatprep.subr.mxu0 %v52_v6 }
  0x28   :  { %182 = vmatpush3.msra.mxu0 %v52_v6 }
  0x29   :  { %183 = vmatprep.subr.mxu0 %v51_v7 }
  0x2a   :  { %184 = vmatpush3.msra.mxu0 %v51_v7 }
  0x2b   :  { %185 = vmatprep.subr.mxu0 %v50_v8 }
  0x2c   :  { %186 = vmatpush3.msra.mxu0 %v50_v8 }
  0x2d   :  { %187 = vmatprep.subr.mxu0 %v49_v9 }
  0x2e   :  { %188 = vmatpush3.msra.mxu0 %v49_v9 }
  0x2f   :  { %189 = vmatprep.subr.mxu0 %v48_v10 }
  0x30   :  { %190 = vmatpush3.msra.mxu0 %v48_v10 }
  0x31   :  { %191 = vmatprep.subr.mxu0 %v47_v11 }
  0x32   :  { %192 = vmatpush3.msra.mxu0 %v47_v11 }
  0x33   :  { %193 = vmatprep.subr.mxu0 %v46_v12 }
  0x34   :  { %194 = vmatpush3.msra.mxu0 %v46_v12 }
  0x35   :  { %195 = vmatprep.subr.mxu0 %v45_v13 }
  0x36   :  { %196 = vmatpush3.msra.mxu0 %v45_v13 }
  0x37   :  { %197 = vmatprep.subr.mxu0 %v44_v14 }
  0x38   :  { %198 = vmatpush3.msra.mxu0 %v44_v14 }
  0x39   :  { %199 = vmatprep.subr.mxu0 %v43_v15 }
  0x3a   :  { %200 = vmatpush3.msra.mxu0 %v43_v15 }
  0x3b   :  { %201 = vmatprep.subr.mxu0 %v42_v16 }
  0x3c   :  { %202 = vmatpush3.msra.mxu0 %v42_v16 }
  0x3d   :  { %204 = vmatmul.mubr.f32.vlgmr.msra.gmra.mxu0 %v41_v17 }
  0xfd   :  { %v205_v18 = vpop.f32.mrf.mxu0 }
  0xfe   :  { %134 = vst [vmem:[#allocation7 + $0x8] sm:$0xff] %v205_v18 }
  0xff   :  { %v124_v19 = vpop.f32.mrf.mxu0 }
 0x100   :  { %133 = vst [vmem:[#allocation7] sm:$0xff] %v124_v19 }
 0x101   :  { %262 = shalt.err (!%p259_p0)
}
 0x102   :  { %146 = dma.vmem_to_hbm [thread:$0]  %s141_s1, 256, %s317_s2, [#allocation4], %s278_s12, %s278_s12, %s279_s13  }
 0x103   :  { %275 = dma.done.wait [#allocation4], 256  }
 0x104   :  { %276 = vsyncadd [#allocation4], 4294967040 }
 0x105   :  { %150 = vsyncpa [#allocation3], 1 }
 0x106   :  { %151 = vsyncpa [#allocation6], 1 }
 0x107   :  { %152 = vsyncpa [#allocation4], 1 }

</bundles_post_ra>
